<compile_context>
chip_gen: v5e
topology: v5e:2x2
jax: 0.10.0
libtpu: 0.0.40
codegen_flags: <defaults>
</compile_context>

<pallas_src>
import jax
import jax.numpy as jnp
from jax.experimental import pallas as pl
from jax.experimental.pallas import tpu as pltpu


def _make_vpu_kernel(F, O):
    """Small-F / small-O path, batch mapped to lanes.

    xT:  [F, TB]   (batch on lanes)
    w1T: [H, F]    (hidden on sublanes)
    b1:  [H, 1]
    w2:  [H, O]
    b2:  SMEM (O,)
    oT:  [O, TB]
    """

    def kernel(xT_ref, w1T_ref, b1_ref, w2_ref, b2_ref, oT_ref):
        xT = xT_ref[...].astype(jnp.float32)            # [F, TB]
        w1T = w1T_ref[...].astype(jnp.float32)          # [H, F]
        b1 = b1_ref[...].astype(jnp.float32)            # [H, 1]
        # K=F contraction as a statically-unrolled broadcast MAC on the VPU.
        h = b1 + w1T[:, 0:1] * xT[0:1, :]               # [H, TB]
        for f in range(1, F):
            h = h + w1T[:, f : f + 1] * xT[f : f + 1, :]
        h = jax.nn.sigmoid(h)                           # exp/recip on the EUP
        w2 = w2_ref[...].astype(jnp.float32)            # [H, O]
        for o in range(O):
            # Sublane (XLU) reduction over H; result is lane-dense [1, TB].
            y = jnp.sum(h * w2[:, o : o + 1], axis=0, keepdims=True) + b2_ref[o]
            oT_ref[o : o + 1, :] = y.astype(oT_ref.dtype)

    return kernel


def _mlp_kernel_mxu(x_ref, w1_ref, b1_ref, w2_ref, b2_ref, o_ref):
    """General path (large F and/or O): MXU matmuls with f32 accumulation."""
    x = x_ref[...]
    h = jnp.dot(x, w1_ref[...], preferred_element_type=jnp.float32) + b1_ref[...]
    h = jax.nn.sigmoid(h)
    y = jnp.dot(h, w2_ref[...], preferred_element_type=jnp.float32) + b2_ref[...]
    o_ref[...] = y.astype(o_ref.dtype)


def net_forward(x, w1, b1, w2, b2, *, tile_b=None):
    """Pallas equivalent of Net.forward: out(sigmoid(hidden(x))).

    x:  [B, F]
    w1: [F, H]  (PyTorch weight already transposed)   b1: [H]
    w2: [H, O]                                        b2: [O]
    """
    B, F = x.shape
    H = w1.shape[1]
    O = w2.shape[1]
    dtype = x.dtype

    compiler_params = pltpu.CompilerParams(
        dimension_semantics=("parallel",),   # batch axis shards across TCs (v7x)
    )

    use_vpu = (F <= 8) and (O <= 8) and (H <= 512)

    if use_vpu:
        # Batch on lanes: tile must be the full B or a multiple of 128 lanes.
        if tile_b is None or (tile_b != B and tile_b % 128 != 0):
            tile_b = B if B <= 512 else 512
        B_pad = pl.cdiv(B, tile_b) * tile_b
        grid = (B_pad // tile_b,)

        xT = x.T                                         # [F, B]
        if B_pad != B:
            xT = jnp.pad(xT, ((0, 0), (0, B_pad - B)))   # zero pad; sliced off below
        w1T = w1.T                                       # [H, F]
        b1c = b1.reshape(H, 1)
        b2s = b2.reshape(O)                              # 1-D SMEM scalar(s)

        resident = lambda shape: pl.BlockSpec(shape, lambda i: (0, 0))

        outT = pl.pallas_call(
            _make_vpu_kernel(F, O),
            out_shape=jax.ShapeDtypeStruct((O, B_pad), dtype),
            grid=grid,
            in_specs=[
                pl.BlockSpec((F, tile_b), lambda i: (0, i)),          # x, batch on lanes
                resident((H, F)),                                     # w1T (VMEM-resident)
                resident((H, 1)),                                     # b1
                resident((H, O)),                                     # w2
                pl.BlockSpec(memory_space=pltpu.MemorySpace.SMEM),    # b2 scalars
            ],
            out_specs=pl.BlockSpec((O, tile_b), lambda i: (0, i)),    # lane-dense stores
            compiler_params=compiler_params,
        )(xT, w1T, b1c, w2, b2s)
        return outT[:, :B].T                                          # [B, O]

    # ---- General MXU fallback (F or O too large for the VPU path) ----
    if tile_b is None or (tile_b != B and tile_b % 8 != 0):
        tile_b = B if B <= 512 else 512
    B_pad = pl.cdiv(B, tile_b) * tile_b
    grid = (B_pad // tile_b,)
    x_p = x if B_pad == B else jnp.pad(x, ((0, B_pad - B), (0, 0)))
    b1_2d = b1.reshape(1, H)
    b2_2d = b2.reshape(1, O)

    resident = lambda shape: pl.BlockSpec(shape, lambda i: (0, 0))

    out = pl.pallas_call(
        _mlp_kernel_mxu,
        out_shape=jax.ShapeDtypeStruct((B_pad, O), dtype),
        grid=grid,
        in_specs=[
            pl.BlockSpec((tile_b, F), lambda i: (i, 0)),
            resident((F, H)),
            resident((1, H)),
            resident((H, O)),
            resident((1, O)),
        ],
        out_specs=pl.BlockSpec((tile_b, O), lambda i: (i, 0)),
        compiler_params=compiler_params,
    )(x_p, w1, b1_2d, w2, b2_2d)
    return out[:B]


def reference_forward(x, w1, b1, w2, b2):
    h = jax.nn.sigmoid(x @ w1 + b1)
    return h @ w2 + b2


if __name__ == "__main__":
    DOMAIN_SIZE = 16
    n_feature, n_hidden, n_output = 1, 32, 1

    key = jax.random.PRNGKey(0)
    k_x, k_w1, k_b1, k_w2, k_b2 = jax.random.split(key, 5)

    # Input mirrors `a.reshape([DOMAIN_SIZE, 1])` -> shape [16, 1]
    x = jnp.linspace(0.0, 1.0, DOMAIN_SIZE, dtype=jnp.float32).reshape(DOMAIN_SIZE, 1)

    # Deterministic PyTorch-Linear-style init: U(-1/sqrt(fan_in), 1/sqrt(fan_in)).
    bound1 = 1.0 / (n_feature ** 0.5)
    bound2 = 1.0 / (n_hidden ** 0.5)
    w1 = jax.random.uniform(k_w1, (n_feature, n_hidden), jnp.float32, -bound1, bound1)
    b1 = jax.random.uniform(k_b1, (n_hidden,), jnp.float32, -bound1, bound1)
    w2 = jax.random.uniform(k_w2, (n_hidden, n_output), jnp.float32, -bound2, bound2)
    b2 = jax.random.uniform(k_b2, (n_output,), jnp.float32, -bound2, bound2)

    out = net_forward(x, w1, b1, w2, b2)
    out = jax.block_until_ready(out)

    ref = reference_forward(x, w1, b1, w2, b2)
    assert out.shape == (DOMAIN_SIZE, n_output), out.shape
    assert jnp.allclose(out, ref, atol=1e-5, rtol=1e-5), (out, ref)

    print("KERNEL_OK")
</pallas_src>

<mosaic_0001>
module attributes {stable_mosaic.version = 11 : i64} {
  func.func @kernel(%arg0: i32, %arg1: memref<1x16xf32, #tpu.memory_space<vmem>>, %arg2: memref<32x1xf32, #tpu.memory_space<vmem>>, %arg3: memref<32x1xf32, #tpu.memory_space<vmem>>, %arg4: memref<32x1xf32, #tpu.memory_space<vmem>>, %arg5: memref<1xf32, #tpu.memory_space<smem>>, %arg6: memref<1x16xf32, #tpu.memory_space<vmem>>) attributes {dimension_semantics = [#tpu.dimension_semantics<parallel>], iteration_bounds = array<i64: 1>, scalar_prefetch = 0 : i64, scratch_operands = 0 : i64, tpu.core_type = #tpu.core_type<tc>, window_params = [{transform_indices = @transform_0, window_bounds = array<i64: 1, 16>}, {pipeline_mode = #tpu.pipeline_mode<synchronous>, transform_indices = @transform_1, window_bounds = array<i64: 32, 1>}, {pipeline_mode = #tpu.pipeline_mode<synchronous>, transform_indices = @transform_2, window_bounds = array<i64: 32, 1>}, {pipeline_mode = #tpu.pipeline_mode<synchronous>, transform_indices = @transform_3, window_bounds = array<i64: 32, 1>}, {transform_indices = @transform_4, window_bounds = array<i64: 1>}, {transform_indices = @transform_5, window_bounds = array<i64: 1, 16>}]} {
    %c0 = arith.constant 0 : index
    %c0_0 = arith.constant 0 : index
    %0 = vector.load %arg1[%c0, %c0_0] : memref<1x16xf32, #tpu.memory_space<vmem>>, vector<1x16xf32>
    %c0_1 = arith.constant 0 : index
    %c0_2 = arith.constant 0 : index
    %1 = vector.load %arg2[%c0_1, %c0_2] : memref<32x1xf32, #tpu.memory_space<vmem>>, vector<32x1xf32>
    %c0_3 = arith.constant 0 : index
    %c0_4 = arith.constant 0 : index
    %2 = vector.load %arg3[%c0_3, %c0_4] : memref<32x1xf32, #tpu.memory_space<vmem>>, vector<32x1xf32>
    %3 = vector.broadcast %1 : vector<32x1xf32> to vector<32x16xf32>
    %4 = vector.broadcast %0 : vector<1x16xf32> to vector<32x16xf32>
    %5 = arith.mulf %3, %4 : vector<32x16xf32>
    %6 = vector.broadcast %2 : vector<32x1xf32> to vector<32x16xf32>
    %7 = arith.addf %6, %5 : vector<32x16xf32>
    %8 = arith.negf %7 : vector<32x16xf32>
    %9 = math.exp %8 : vector<32x16xf32>
    %cst = arith.constant 1.000000e+00 : f32
    %10 = vector.broadcast %cst : f32 to vector<32x16xf32>
    %11 = arith.addf %10, %9 : vector<32x16xf32>
    %12 = arith.divf %10, %11 : vector<32x16xf32>
    %c0_5 = arith.constant 0 : index
    %c0_6 = arith.constant 0 : index
    %13 = vector.load %arg4[%c0_5, %c0_6] : memref<32x1xf32, #tpu.memory_space<vmem>>, vector<32x1xf32>
    %14 = vector.broadcast %13 : vector<32x1xf32> to vector<32x16xf32>
    %15 = arith.mulf %12, %14 : vector<32x16xf32>
    %cst_7 = arith.constant dense<0.000000e+00> : vector<16xf32>
    %16 = vector.multi_reduction <add>, %15, %cst_7 [0] : vector<32x16xf32> to vector<16xf32>
    %17 = vector.shape_cast %16 : vector<16xf32> to vector<1x16xf32>
    %c0_8 = arith.constant 0 : index
    %18 = memref.load %arg5[%c0_8] : memref<1xf32, #tpu.memory_space<smem>>
    %19 = vector.broadcast %18 : f32 to vector<1x16xf32>
    %20 = arith.addf %17, %19 : vector<1x16xf32>
    %c0_9 = arith.constant 0 : index
    %c0_10 = arith.constant 0 : index
    %21 = vector.load %arg6[%c0_9, %c0_10] : memref<1x16xf32, #tpu.memory_space<vmem>>, vector<1x16xf32>
    tpu.vector_store %arg6[%c0_9, %c0_10], %20 {strides = array<i32>} : memref<1x16xf32, #tpu.memory_space<vmem>>, vector<1x16xf32>,
    return
  }
  func.func @transform_0(%arg0: i32) -> (i32, i32) {
    %c0_i32 = arith.constant 0 : i32
    %c0_i32_0 = arith.constant 0 : i32
    return %c0_i32, %arg0 : i32, i32
  }
  func.func @transform_1(%arg0: i32) -> (i32, i32) {
    %c0_i32 = arith.constant 0 : i32
    %c0_i32_0 = arith.constant 0 : i32
    %c0_i32_1 = arith.constant 0 : i32
    return %c0_i32, %c0_i32_0 : i32, i32
  }
  func.func @transform_2(%arg0: i32) -> (i32, i32) {
    %c0_i32 = arith.constant 0 : i32
    %c0_i32_0 = arith.constant 0 : i32
    %c0_i32_1 = arith.constant 0 : i32
    return %c0_i32, %c0_i32_0 : i32, i32
  }
  func.func @transform_3(%arg0: i32) -> (i32, i32) {
    %c0_i32 = arith.constant 0 : i32
    %c0_i32_0 = arith.constant 0 : i32
    %c0_i32_1 = arith.constant 0 : i32
    return %c0_i32, %c0_i32_0 : i32, i32
  }
  func.func @transform_4(%arg0: i32) -> i32 {
    %c0_i32 = arith.constant 0 : i32
    %c0_i32_0 = arith.constant 0 : i32
    return %c0_i32 : i32
  }
  func.func @transform_5(%arg0: i32) -> (i32, i32) {
    %c0_i32 = arith.constant 0 : i32
    %c0_i32_0 = arith.constant 0 : i32
    return %c0_i32, %arg0 : i32, i32
  }
}

</mosaic_0001>

<bundles_post_ra>
// kernel: tpu_custom_call.1
= control target key start
LH: loop header
LB: loop body
LE: loop exit
PB: predicated region body
PF: predicated region fallthrough
CT: control target
= control target key end

     0   :  { %v273_v2 = vmov 0   ;;  %s360_s0 = inlined_call_operand.vmem [shape: f32[1,16], index: 0, kind: input, shape index: {}]   ;;  %s361_s1 = inlined_call_operand.vmem [shape: f32[32,1], index: 1, kind: input, shape index: {}]   ;;  %s362_s2 = inlined_call_operand.vmem [shape: f32[32,1], index: 2, kind: input, shape index: {}]   ;;  %s363_s3 = inlined_call_operand.vmem [shape: f32[32,1], index: 3, kind: input, shape index: {}]   ;;  %s364_s4 = inlined_call_operand.<no memory space> [shape: f32[1], index: 4, kind: input, shape index: {}]   ;;  %s365_s5 = inlined_call_operand.hbm [shape: f32[1,16], index: 5, kind: output, shape index: {}]  }
   0x1   :  { %v25_v0 = vld [vmem:[%s361_s1 + $0x10] sm:$0xff]  ;;  %v23_v1 = vld [vmem:[%s361_s1] sm:$0xff]  ;;  %228 = vset.pattern.permute.xlu1 %v273_v2  ;;  %227 = vset.pattern.permute.xlu0 %v273_v2  ;;  %v28_v3 = vld [vmem:[%s362_s2 + $0x8] sm:$0xff] }
   0x2   :  { %43 = vperm.xlu1 %228, %v25_v0   ;;  %33 = vperm.xlu0 %227, %v23_v1  }
   0x3   :  { %229 = vset.pattern.permute.xlu2 %v273_v2 }
   0x4   :  { %65 = vperm.xlu2 %229, %v28_v3  }
   0x5   :  { %11 = vsyncpa [#allocation4], 0  ;;  %v27_v4 = vld [vmem:[%s362_s2] sm:$0xff]  ;;  %v24_v5 = vld [vmem:[%s361_s1 + $0x8] sm:$0xff]  ;;  %vm186_vm14 = vcmask 130048   ;;  %s274_s17 = smov [#allocation3]  }
   0x6   :  { %v26_v6 = vld [vmem:[%s361_s1 + $0x18] sm:$0xff]  ;;  %v29_v8 = vld [vmem:[%s362_s2 + $0x10] sm:$0xff]  ;;  %v158_v9 = vld [vmem:[%s363_s3] sm:$0xff]  ;;  %s210_s18 = sshll.u32 %s274_s17, 4  ;;  %s212_s21 = sshll.u32 %s365_s5, 4  ;;  %s211_s18 = int_to_ptr.vmem [resolvable:$true] %s210_s18  ;;  %s213_s21 = int_to_ptr.hbm [resolvable:$true] %s212_s21 }
   0x7   :  { %v30_v7 = vld [vmem:[%s362_s2 + $0x18] sm:$0xff]  ;;  %v160_v10 = vld [vmem:[%s363_s3 + $0x10] sm:$0xff]  ;;  %v159_v11 = vld [vmem:[%s363_s3 + $0x8] sm:$0xff] }
   0x8   :  { %v161_v12 = vld [vmem:[%s363_s3 + $0x18] sm:$0xff]  ;;  %v230_v15 = vld [vmem:[%s360_s0] ss:$0 sm:$0xff] }
   0xa   :  { %60 = vperm.xlu1 %228, %v27_v4   ;;  %38 = vperm.xlu0 %227, %v24_v5  }
   0xc   :  { %48 = vperm.xlu2 %229, %v26_v6  }
  0x12   :  { %75 = vperm.xlu1 %228, %v30_v7   ;;  %70 = vperm.xlu0 %227, %v29_v8  }
  0x14   :  { %164 = vperm.xlu2 %229, %v158_v9  }
  0x1a   :  { %174 = vperm.xlu1 %228, %v160_v10   ;;  %169 = vperm.xlu0 %227, %v159_v11  }
  0x1c   :  { %179 = vperm.xlu2 %229, %v161_v12  }
  0x5e   :  { %v66_v16 = vpop.permute.xlu2 %65 }
  0x66   :  { %v49_v25 = vpop.permute.xlu2 %48 }
  0x67   :  { %v57_v26 = vmul.f32 %v230_v15, %v49_v25 }
  0x6e   :  { %v165_v60 = vpop.permute.xlu2 %164 }
  0x74   :  { %v44_v13 = vpop.permute.xlu1 %43  ;;  %v34_v14 = vpop.permute.xlu0 %33 }
  0x75   :  { %v54_v17 = vmul.f32 %v230_v15, %v34_v14  ;;  %v56_v27 = vmul.f32 %v230_v15, %v44_v13 }
  0x7c   :  { %v61_v18 = vpop.permute.xlu1 %60  ;;  %v39_v19 = vpop.permute.xlu0 %38 }
  0x7d   :  { %v78_v20 = vadd.f32 %v61_v18, %v54_v17  ;;  %v55_v21 = vmul.f32 %v230_v15, %v39_v19 }
  0x7f   :  { %v221_v22 = vmul.f32 -1.442695, %v78_v20  ;;  %v79_v23 = vadd.f32 %v66_v16, %v55_v21 }
  0x81   :  { %231 = vpow2.f32 %v221_v22  ;;  %v222_v24 = vmul.f32 -1.442695, %v79_v23  ;;  %v180_v23 = vpop.permute.xlu2 %179 }
  0x83   :  { %233 = vpow2.f32 %v222_v24 }
  0x84   :  { %v76_v28 = vpop.permute.xlu1 %75  ;;  %v71_v29 = vpop.permute.xlu0 %70 }
  0x85   :  { %v81_v30 = vadd.f32 %v76_v28, %v57_v26  ;;  %v80_v31 = vadd.f32 %v71_v29, %v56_v27 }
  0x87   :  { %v232_v32 = vpop.eup %231  ;;  %v224_v33 = vmul.f32 -1.442695, %v81_v30  ;;  %v223_v34 = vmul.f32 -1.442695, %v80_v31 }
  0x88   :  { %v94_v35 = vadd.f32 1.0, %v232_v32 }
  0x89   :  { %v234_v36 = vpop.eup %233  ;;  %235 = vpow2.f32 %v224_v33 }
  0x8a   :  { %237 = vrcp.f32 %v94_v35  ;;  %v95_v37 = vadd.f32 1.0, %v234_v36  ;;  %vm103_vm2 = vweird.f32 %v94_v35  ;;  %v107_v54 = vand.u32 2147483647, %v94_v35 }
  0x8b   :  { %239 = vpow2.f32 %v223_v34  ;;  %v109_v55 = vand.u32 2147483648, %v94_v35 }
  0x8c   :  { %241 = vrcp.f32 %v95_v37  ;;  %v122_v49 = vand.u32 2147483647, %v95_v37  ;;  %v124_v50 = vand.u32 2147483648, %v95_v37  ;;  %vm118_vm4 = vweird.f32 %v95_v37  ;;  %v170_v10 = vpop.permute.xlu0 %169  ;;  %v175_v24 = vpop.permute.xlu1 %174 }
  0x8d   :  { %vm108_vm7 = vcmp.eq.f32.partialorder %v107_v54, 8.507059e+37  ;;  %v110_v3 = vor.u32 1.1754944e-38, %v109_v55 }
  0x8e   :  { %vm123_vm6 = vcmp.eq.f32.partialorder %v122_v49, 8.507059e+37  ;;  %v125_v61 = vor.u32 1.1754944e-38, %v124_v50 }
  0x8f   :  { %v236_v38 = vpop.eup %235 }
  0x90   :  { %v238_v39 = vpop.eup %237  ;;  %v97_v40 = vadd.f32 1.0, %v236_v38 }
  0x91   :  { %v240_v41 = vpop.eup %239  ;;  %v99_v42 = vmul.f32 %v238_v39, %v94_v35  ;;  %vm104_vm0 = vweird.f32 %v238_v39 }
  0x92   :  { %v242_v43 = vpop.eup %241  ;;  %243 = vrcp.f32 %v97_v40  ;;  %v96_v44 = vadd.f32 1.0, %v240_v41  ;;  %vm344_vm3 = vmor %vm103_vm2, %vm104_vm0  ;;  %v154_v2 = vand.u32 2147483648, %v97_v40  ;;  %v152_v7 = vand.u32 2147483647, %v97_v40 }
  0x93   :  { %v100_v45 = vsub.f32 1.0, %v99_v42  ;;  %v114_v46 = vmul.f32 %v242_v43, %v95_v37  ;;  %vm119_vm1 = vweird.f32 %v242_v43  ;;  %vm148_vm9 = vweird.f32 %v97_v40 }
  0x94   :  { %245 = vrcp.f32 %v96_v44  ;;  %vm120_vm5 = vmor %vm118_vm4, %vm119_vm1  ;;  %v137_v8 = vand.u32 2147483647, %v96_v44  ;;  %v139_v9 = vand.u32 2147483648, %v96_v44  ;;  %vm133_vm11 = vweird.f32 %v96_v44 }
  0x95   :  { %v101_v47 = vmul.f32 %v238_v39, %v100_v45  ;;  %v115_v48 = vsub.f32 1.0, %v114_v46  ;;  %v155_v15 = vor.u32 1.1754944e-38, %v154_v2  ;;  %vm153_vm13 = vcmp.eq.f32.partialorder %v152_v7, 8.507059e+37 }
  0x96   :  { %v140_v19 = vor.u32 1.1754944e-38, %v139_v9  ;;  %vm138_vm0 = vcmp.eq.f32.partialorder %v137_v8, 8.507059e+37  ;;  %vm203_vm1 = vcmask 122880  }
  0x97   :  { %v102_v51 = vadd.f32 %v238_v39, %v101_v47  ;;  %v116_v52 = vmul.f32 %v242_v43, %v115_v48 }
  0x98   :  { %v244_v53 = vpop.eup %243 }
  0x99   :  { %v144_v56 = vmul.f32 %v244_v53, %v97_v40  ;;  %v117_v58 = vadd.f32 %v242_v43, %v116_v52  ;;  %v106_v0 = vsel %vm344_vm3, %v238_v39, %v102_v51  ;;  %vm149_vm8 = vweird.f32 %v244_v53 }
  0x9a   :  { %v246_v59 = vpop.eup %245  ;;  %v111_v11 = vsel %vm108_vm7, %v110_v3, %v106_v0  ;;  %vm150_vm12 = vmor %vm148_vm9, %vm149_vm8  ;;  %v201_v39 = vstv %s364_s4 }
  0x9b   :  { %v145_v62 = vsub.f32 1.0, %v144_v56  ;;  %v129_v63 = vmul.f32 %v246_v59, %v96_v44  ;;  %v121_v1 = vsel %vm120_vm5, %v242_v43, %v117_v58  ;;  %vm134_vm10 = vweird.f32 %v246_v59 }
  0x9c   :  { %v126_v4 = vsel %vm123_vm6, %v125_v61, %v121_v1  ;;  %v182_v18 = vmul.f32 %v165_v60, %v111_v11  ;;  %vm135_vm15 = vmor %vm133_vm11, %vm134_vm10 }
  0x9d   :  { %v146_v5 = vmul.f32 %v244_v53, %v145_v62  ;;  %v130_v6 = vsub.f32 1.0, %v129_v63  ;;  %v183_v14 = vmul.f32 %v170_v10, %v126_v4 }
  0x9e   :  { %v187_v28 = vsel %vm186_vm14, %v182_v18, 0.0 }
  0x9f   :  { %v131_v12 = vmul.f32 %v246_v59, %v130_v6  ;;  %v147_v13 = vadd.f32 %v244_v53, %v146_v5  ;;  %v188_v22 = vsel %vm186_vm14, %v183_v14, 0.0 }
  0xa0   :  { %v189_v29 = vadd.f32 %v188_v22, %v187_v28 }
  0xa1   :  { %v132_v16 = vadd.f32 %v246_v59, %v131_v12  ;;  %v151_v17 = vsel %vm150_vm12, %v244_v53, %v147_v13 }
  0xa2   :  { %v156_v20 = vsel %vm153_vm13, %v155_v15, %v151_v17 }
  0xa3   :  { %v136_v21 = vsel %vm135_vm15, %v246_v59, %v132_v16  ;;  %v185_v27 = vmul.f32 %v180_v23, %v156_v20 }
  0xa4   :  { %v141_v25 = vsel %vm138_vm0, %v140_v19, %v136_v21 }
  0xa5   :  { %v184_v26 = vmul.f32 %v175_v24, %v141_v25  ;;  %v192_v32 = vsel %vm186_vm14, %v185_v27, 0.0 }
  0xa7   :  { %v190_v30 = vsel %vm186_vm14, %v184_v26, 0.0 }
  0xa8   :  { %v191_v31 = vadd.f32 %v190_v30, %v189_v29 }
  0xaa   :  { %v193_v33 = vadd.f32 %v192_v32, %v191_v31 }
  0xac   :  { %v194_v34 = vrot.slane %v193_v33, 4 }
  0xae   :  { %v195_v35 = vadd.f32 %v194_v34, %v193_v33 }
  0xb0   :  { %v196_v36 = vrot.slane %v195_v35, 2 }
  0xb2   :  { %v197_v37 = vadd.f32 %v196_v36, %v195_v35 }
  0xb4   :  { %v198_v38 = vrot.slane %v197_v37, 1 }
  0xb6   :  { %v199_v40 = vadd.f32 %v198_v38, %v197_v37 }
  0xb8   :  { %v202_v41 = vadd.f32 %v201_v39, %v199_v40 }
  0xba   :  { %204 = vst.msk [vmem:[#allocation3] sm:$0x1] %vm203_vm1, %v202_v41 }
  0xbb   :  { %215 = dma.vmem_to_hbm [thread:$0]  %s211_s18, 16, %s213_s21, [#allocation4]  }
  0xbc   :  { %271 = dma.done.wait [#allocation4], 16  }
  0xbd   :  { %272 = vsyncadd [#allocation4], 4294967280 }
  0xbe   :  { %220 = vsyncpa [#allocation4], 1 }

</bundles_post_ra>
